<compile_context>
chip_gen: v6e
topology: v6e:2x2x1
jax: 0.10.0
libtpu: 0.0.40
codegen_flags: <defaults>
</compile_context>

<pallas_src>
import jax
import jax.numpy as jnp
from jax.experimental import pallas as pl
from jax.experimental.pallas import tpu as pltpu

# Layer hyper-params (match the PyTorch module)
K1, D1, C1 = 2, 1, 4     # conv1: in=1,  out=4,  k=2, dilation=1
K2, D2, C2 = 4, 2, 8     # conv2: in=4,  out=8,  k=4, dilation=2
K3, D3, C3 = 8, 4, 16    # conv3: in=8,  out=16, k=8, dilation=4
CIN = 1
RF = D1 * (K1 - 1) + D2 * (K2 - 1) + D3 * (K3 - 1)   # receptive field - 1 = 35

# (B, o, i) x (B, i, l) -> (B, o, l): batched matmul, result in final layout
# (no transpose inserted by the lowering).
_DN_BATCHED = (((2,), (1,)), ((0,), (0,)))


def _round_up(a, m):
    return (a + m - 1) // m * m


def tdnn_kernel(x_ref, w1_ref, b1_ref, w2_ref, b2_ref, w3_ref, b3_ref, o_ref):
    """One batch tile: x (B,1,Lp) -> o (B,C3,L3p), all three layers fused."""
    B = x_ref.shape[0]
    Lp = x_ref.shape[-1]
    L1 = Lp - D1 * (K1 - 1)
    L2 = L1 - D2 * (K2 - 1)
    L3 = L2 - D3 * (K3 - 1)            # == o_ref.shape[-1], multiple of 128

    x = x_ref[...][:, 0, :]            # (B, Lp)

    # ---- conv1 + relu: C_in=1, K=2 -> two broadcast FMAs on the VPU,
    #      bias folded into the accumulator init.
    h1 = jnp.broadcast_to(b1_ref[...][None, :, :], (B, C1, L1))
    for k in range(K1):
        s = k * D1
        h1 = h1 + w1_ref[k][None, :, :] * x[:, None, s:s + L1]
    h1 = jnp.maximum(h1, 0.0)

    # ---- conv2 + relu: per-tap (B,C2,C1)x(B,C1,L2) dots accumulated in f32.
    #      No im2col buffer is materialized.
    h2 = jnp.broadcast_to(b2_ref[...][None, :, :], (B, C2, L2))
    for k in range(K2):
        s = k * D2
        wk = jnp.broadcast_to(w2_ref[k][None, :, :], (B, C2, C1))
        h2 = h2 + jax.lax.dot_general(wk, h1[:, :, s:s + L2], _DN_BATCHED,
                                      preferred_element_type=jnp.float32)
    h2 = jnp.maximum(h2, 0.0)

    # ---- conv3 + relu: per-tap (B,C3,C2)x(B,C2,L3) dots accumulated in f32.
    h3 = jnp.broadcast_to(b3_ref[...][None, :, :], (B, C3, L3))
    for k in range(K3):
        s = k * D3
        wk = jnp.broadcast_to(w3_ref[k][None, :, :], (B, C3, C2))
        h3 = h3 + jax.lax.dot_general(wk, h2[:, :, s:s + L3], _DN_BATCHED,
                                      preferred_element_type=jnp.float32)
    h3 = jnp.maximum(h3, 0.0)

    o_ref[...] = h3.astype(o_ref.dtype)   # lane-dense (B, C3, L3p) store


def _pick_b_tile(n, l3p):
    """Largest power-of-two batch tile such that (a) there are >= 2 grid steps
    (both v7x TensorCores get work), (b) per-step VMEM stays bounded for long
    sequences, (c) tile <= 64."""
    lp = l3p + RF
    l1 = lp - D1 * (K1 - 1)
    l2 = l1 - D2 * (K2 - 1)
    # rough f32 bytes per batch element: double-buffered in/out blocks plus
    # live intermediates (h1, h2, conv3 accumulator).
    per_elem = 4 * (2 * lp + C1 * l1 + C2 * l2 + 3 * C3 * l3p)
    budget = 24 * 1024 * 1024
    b_vmem = max(1, budget // per_elem)
    b_par = max(1, n // 2)            # ceil(n / b) >= 2 whenever n >= 2
    cap = max(1, min(64, b_vmem, b_par, n))
    b = 1
    while b * 2 <= cap:
        b *= 2
    return b


def tdnn_forward(x, w1, b1, w2, b2, w3, b3, *, b_tile=None,
                 out_dtype=jnp.float32):
    N, cin, L = x.shape
    assert cin == CIN
    L3 = L - RF
    assert L3 > 0, "sequence too short for this receptive field"

    # Pad the per-sample output length to a multiple of 128 lanes so stores
    # are unmasked / lane-dense; the padding is sliced off below.
    L3p = _round_up(L3, 128)
    Lp = L3p + RF

    B = _pick_b_tile(N, L3p) if b_tile is None else b_tile
    G = pl.cdiv(N, B)
    Np = G * B

    # Pad batch and time with zeros; no interleave / transpose anywhere.
    xs = jnp.pad(x.astype(jnp.float32), ((0, Np - N), (0, 0), (0, Lp - L)))

    # Re-layout weights so the per-tap slice is a free leading-axis index:
    # (C_out, C_in, K) -> (K, C_out, C_in); biases -> (C, 1).
    w1t = jnp.transpose(w1, (2, 0, 1))          # (K1, C1, CIN=1)
    w2t = jnp.transpose(w2, (2, 0, 1))          # (K2, C2, C1)
    w3t = jnp.transpose(w3, (2, 0, 1))          # (K3, C3, C2)
    b1c, b2c, b3c = b1.reshape(C1, 1), b2.reshape(C2, 1), b3.reshape(C3, 1)

    out = pl.pallas_call(
        tdnn_kernel,
        out_shape=jax.ShapeDtypeStruct((Np, C3, L3p), out_dtype),
        grid=(G,),
        in_specs=[
            pl.BlockSpec((B, 1, Lp), lambda g: (g, 0, 0)),        # x batch tile
            pl.BlockSpec((K1, C1, CIN), lambda g: (0, 0, 0)),     # w1 (resident)
            pl.BlockSpec((C1, 1), lambda g: (0, 0)),              # b1
            pl.BlockSpec((K2, C2, C1), lambda g: (0, 0, 0)),      # w2
            pl.BlockSpec((C2, 1), lambda g: (0, 0)),              # b2
            pl.BlockSpec((K3, C3, C2), lambda g: (0, 0, 0)),      # w3
            pl.BlockSpec((C3, 1), lambda g: (0, 0)),              # b3
        ],
        out_specs=pl.BlockSpec((B, C3, L3p), lambda g: (g, 0, 0)),
        compiler_params=pltpu.CompilerParams(
            dimension_semantics=("parallel",),
            vmem_limit_bytes=32 * 1024 * 1024),
    )(xs, w1t, b1c, w2t, b2c, w3t, b3c)

    # TODO(synk): for very long sequences on v7x (64 MiB VMEM) add a second,
    # time-tiled grid axis with an RF-sample input halo instead of only
    # shrinking the batch tile.

    # Strip batch/time padding; the kernel already wrote the final layout,
    # so no transpose / un-interleave is needed here.
    return out[:N, :, :L3]


def _ref_forward(x, w1, b1, w2, b2, w3, b3):
    """Pure-JAX reference (matches torch.nn.Conv1d semantics)."""
    dn = ("NCW", "OIW", "NCW")

    def conv1d(h, w, b, dil):
        y = jax.lax.conv_general_dilated(
            h, w, window_strides=(1,), padding="VALID",
            rhs_dilation=(dil,), dimension_numbers=dn)
        return jnp.maximum(y + b[None, :, None], 0.0)

    h = conv1d(x, w1, b1, D1)
    h = conv1d(h, w2, b2, D2)
    h = conv1d(h, w3, b3, D3)
    return h


def _init_params(key):
    """Deterministic init mimicking PyTorch Conv1d default U[-1/sqrt(fan_in), +]."""
    ks = jax.random.split(key, 6)

    def uni(k, shape, fan_in):
        bound = 1.0 / jnp.sqrt(fan_in)
        return jax.random.uniform(k, shape, jnp.float32, -bound, bound)

    w1 = uni(ks[0], (C1, CIN, K1), CIN * K1)
    b1 = uni(ks[1], (C1,), CIN * K1)
    w2 = uni(ks[2], (C2, C1, K2), C1 * K2)
    b2 = uni(ks[3], (C2,), C1 * K2)
    w3 = uni(ks[4], (C3, C2, K3), C2 * K3)
    b3 = uni(ks[5], (C3,), C2 * K3)
    return w1, b1, w2, b2, w3, b3


if __name__ == "__main__":
    key = jax.random.PRNGKey(0)
    k_x, k_p = jax.random.split(key)

    N, L = 2, 64                      # input (2, 1, 64) -> output (2, 16, 29)
    x = jax.random.normal(k_x, (N, CIN, L), jnp.float32)
    params = _init_params(k_p)

    out = tdnn_forward(x, *params)
    out = jax.block_until_ready(out)

    ref = _ref_forward(x, *params)
    assert out.shape == ref.shape == (N, C3, L - RF), (out.shape, ref.shape)
    assert jnp.allclose(out, ref, atol=1e-5, rtol=1e-5), "mismatch vs JAX reference"

    print("KERNEL_OK")
</pallas_src>

<mosaic_0001>
module attributes {stable_mosaic.version = 11 : i64} {
  func.func @tdnn_kernel(%arg0: i32, %arg1: memref<1x1x163xf32, #tpu.memory_space<vmem>>, %arg2: memref<2x4x1xf32, #tpu.memory_space<vmem>>, %arg3: memref<4x1xf32, #tpu.memory_space<vmem>>, %arg4: memref<4x8x4xf32, #tpu.memory_space<vmem>>, %arg5: memref<8x1xf32, #tpu.memory_space<vmem>>, %arg6: memref<8x16x8xf32, #tpu.memory_space<vmem>>, %arg7: memref<16x1xf32, #tpu.memory_space<vmem>>, %arg8: memref<1x16x128xf32, #tpu.memory_space<vmem>>) attributes {dimension_semantics = [#tpu.dimension_semantics<parallel>], iteration_bounds = array<i64: 2>, scalar_prefetch = 0 : i64, scratch_operands = 0 : i64, tpu.core_type = #tpu.core_type<tc>, window_params = [{transform_indices = @transform_0, window_bounds = array<i64: 1, 1, 163>}, {pipeline_mode = #tpu.pipeline_mode<synchronous>, transform_indices = @transform_1, window_bounds = array<i64: 2, 4, 1>}, {pipeline_mode = #tpu.pipeline_mode<synchronous>, transform_indices = @transform_2, window_bounds = array<i64: 4, 1>}, {pipeline_mode = #tpu.pipeline_mode<synchronous>, transform_indices = @transform_3, window_bounds = array<i64: 4, 8, 4>}, {pipeline_mode = #tpu.pipeline_mode<synchronous>, transform_indices = @transform_4, window_bounds = array<i64: 8, 1>}, {pipeline_mode = #tpu.pipeline_mode<synchronous>, transform_indices = @transform_5, window_bounds = array<i64: 8, 16, 8>}, {pipeline_mode = #tpu.pipeline_mode<synchronous>, transform_indices = @transform_6, window_bounds = array<i64: 16, 1>}, {transform_indices = @transform_7, window_bounds = array<i64: 1, 16, 128>}]} {
    %c0 = arith.constant 0 : index
    %c0_0 = arith.constant 0 : index
    %c0_1 = arith.constant 0 : index
    %0 = vector.load %arg1[%c0, %c0_0, %c0_1] : memref<1x1x163xf32, #tpu.memory_space<vmem>>, vector<1x1x163xf32>
    %1 = vector.shape_cast %0 : vector<1x1x163xf32> to vector<1x163xf32>
    %c0_2 = arith.constant 0 : index
    %c0_3 = arith.constant 0 : index
    %2 = vector.load %arg3[%c0_2, %c0_3] : memref<4x1xf32, #tpu.memory_space<vmem>>, vector<4x1xf32>
    %3 = vector.shape_cast %2 : vector<4x1xf32> to vector<1x4x1xf32>
    %4 = vector.shape_cast %3 : vector<1x4x1xf32> to vector<1x4x1xf32>
    %5 = vector.broadcast %4 : vector<1x4x1xf32> to vector<1x4x162xf32>
    %c0_4 = arith.constant 0 : index
    %c0_5 = arith.constant 0 : index
    %c0_6 = arith.constant 0 : index
    %6 = vector.load %arg2[%c0_4, %c0_5, %c0_6] : memref<2x4x1xf32, #tpu.memory_space<vmem>>, vector<1x4x1xf32>
    %7 = vector.shape_cast %6 : vector<1x4x1xf32> to vector<4x1xf32>
    %8 = vector.shape_cast %7 : vector<4x1xf32> to vector<1x4x1xf32>
    %9 = vector.extract_strided_slice %1 {offsets = [0, 0], sizes = [1, 162], strides = [1, 1]} : vector<1x163xf32> to vector<1x162xf32>
    %10 = vector.shape_cast %9 : vector<1x162xf32> to vector<1x1x162xf32>
    %11 = vector.broadcast %8 : vector<1x4x1xf32> to vector<1x4x162xf32>
    %12 = vector.broadcast %10 : vector<1x1x162xf32> to vector<1x4x162xf32>
    %13 = arith.mulf %11, %12 : vector<1x4x162xf32>
    %14 = arith.addf %5, %13 : vector<1x4x162xf32>
    %c1 = arith.constant 1 : index
    %c0_7 = arith.constant 0 : index
    %c0_8 = arith.constant 0 : index
    %15 = vector.load %arg2[%c1, %c0_7, %c0_8] : memref<2x4x1xf32, #tpu.memory_space<vmem>>, vector<1x4x1xf32>
    %16 = vector.shape_cast %15 : vector<1x4x1xf32> to vector<4x1xf32>
    %17 = vector.shape_cast %16 : vector<4x1xf32> to vector<1x4x1xf32>
    %18 = vector.extract_strided_slice %1 {offsets = [0, 1], sizes = [1, 162], strides = [1, 1]} : vector<1x163xf32> to vector<1x162xf32>
    %19 = vector.shape_cast %18 : vector<1x162xf32> to vector<1x1x162xf32>
    %20 = vector.broadcast %17 : vector<1x4x1xf32> to vector<1x4x162xf32>
    %21 = vector.broadcast %19 : vector<1x1x162xf32> to vector<1x4x162xf32>
    %22 = arith.mulf %20, %21 : vector<1x4x162xf32>
    %23 = arith.addf %14, %22 : vector<1x4x162xf32>
    %cst = arith.constant 0.000000e+00 : f32
    %24 = vector.broadcast %cst : f32 to vector<1x4x162xf32>
    %25 = arith.maximumf %23, %24 : vector<1x4x162xf32>
    %c0_9 = arith.constant 0 : index
    %c0_10 = arith.constant 0 : index
    %26 = vector.load %arg5[%c0_9, %c0_10] : memref<8x1xf32, #tpu.memory_space<vmem>>, vector<8x1xf32>
    %27 = vector.shape_cast %26 : vector<8x1xf32> to vector<1x8x1xf32>
    %28 = vector.shape_cast %27 : vector<1x8x1xf32> to vector<1x8x1xf32>
    %29 = vector.broadcast %28 : vector<1x8x1xf32> to vector<1x8x156xf32>
    %c0_11 = arith.constant 0 : index
    %c0_12 = arith.constant 0 : index
    %c0_13 = arith.constant 0 : index
    %30 = vector.load %arg4[%c0_11, %c0_12, %c0_13] : memref<4x8x4xf32, #tpu.memory_space<vmem>>, vector<1x8x4xf32>
    %31 = vector.shape_cast %30 : vector<1x8x4xf32> to vector<8x4xf32>
    %32 = vector.shape_cast %31 : vector<8x4xf32> to vector<1x8x4xf32>
    %33 = vector.extract_strided_slice %25 {offsets = [0, 0, 0], sizes = [1, 4, 156], strides = [1, 1, 1]} : vector<1x4x162xf32> to vector<1x4x156xf32>
    %cst_14 = arith.constant dense<0.000000e+00> : vector<1x8x156xf32>
    %34 = tpu.matmul %32, %33, %cst_14 {dimension_numbers = #tpu.dot_dimension_numbers<[2], [1], [1], [2], [0, 0, 0, 1, 1, 2], [0], [0]>} : vector<1x8x4xf32>, vector<1x4x156xf32>, vector<1x8x156xf32> -> vector<1x8x156xf32>
    %35 = arith.addf %29, %34 : vector<1x8x156xf32>
    %c1_15 = arith.constant 1 : index
    %c0_16 = arith.constant 0 : index
    %c0_17 = arith.constant 0 : index
    %36 = vector.load %arg4[%c1_15, %c0_16, %c0_17] : memref<4x8x4xf32, #tpu.memory_space<vmem>>, vector<1x8x4xf32>
    %37 = vector.shape_cast %36 : vector<1x8x4xf32> to vector<8x4xf32>
    %38 = vector.shape_cast %37 : vector<8x4xf32> to vector<1x8x4xf32>
    %39 = vector.extract_strided_slice %25 {offsets = [0, 0, 2], sizes = [1, 4, 156], strides = [1, 1, 1]} : vector<1x4x162xf32> to vector<1x4x156xf32>
    %cst_18 = arith.constant dense<0.000000e+00> : vector<1x8x156xf32>
    %40 = tpu.matmul %38, %39, %cst_18 {dimension_numbers = #tpu.dot_dimension_numbers<[2], [1], [1], [2], [0, 0, 0, 1, 1, 2], [0], [0]>} : vector<1x8x4xf32>, vector<1x4x156xf32>, vector<1x8x156xf32> -> vector<1x8x156xf32>
    %41 = arith.addf %35, %40 : vector<1x8x156xf32>
    %c2 = arith.constant 2 : index
    %c0_19 = arith.constant 0 : index
    %c0_20 = arith.constant 0 : index
    %42 = vector.load %arg4[%c2, %c0_19, %c0_20] : memref<4x8x4xf32, #tpu.memory_space<vmem>>, vector<1x8x4xf32>
    %43 = vector.shape_cast %42 : vector<1x8x4xf32> to vector<8x4xf32>
    %44 = vector.shape_cast %43 : vector<8x4xf32> to vector<1x8x4xf32>
    %45 = vector.extract_strided_slice %25 {offsets = [0, 0, 4], sizes = [1, 4, 156], strides = [1, 1, 1]} : vector<1x4x162xf32> to vector<1x4x156xf32>
    %cst_21 = arith.constant dense<0.000000e+00> : vector<1x8x156xf32>
    %46 = tpu.matmul %44, %45, %cst_21 {dimension_numbers = #tpu.dot_dimension_numbers<[2], [1], [1], [2], [0, 0, 0, 1, 1, 2], [0], [0]>} : vector<1x8x4xf32>, vector<1x4x156xf32>, vector<1x8x156xf32> -> vector<1x8x156xf32>
    %47 = arith.addf %41, %46 : vector<1x8x156xf32>
    %c3 = arith.constant 3 : index
    %c0_22 = arith.constant 0 : index
    %c0_23 = arith.constant 0 : index
    %48 = vector.load %arg4[%c3, %c0_22, %c0_23] : memref<4x8x4xf32, #tpu.memory_space<vmem>>, vector<1x8x4xf32>
    %49 = vector.shape_cast %48 : vector<1x8x4xf32> to vector<8x4xf32>
    %50 = vector.shape_cast %49 : vector<8x4xf32> to vector<1x8x4xf32>
    %51 = vector.extract_strided_slice %25 {offsets = [0, 0, 6], sizes = [1, 4, 156], strides = [1, 1, 1]} : vector<1x4x162xf32> to vector<1x4x156xf32>
    %cst_24 = arith.constant dense<0.000000e+00> : vector<1x8x156xf32>
    %52 = tpu.matmul %50, %51, %cst_24 {dimension_numbers = #tpu.dot_dimension_numbers<[2], [1], [1], [2], [0, 0, 0, 1, 1, 2], [0], [0]>} : vector<1x8x4xf32>, vector<1x4x156xf32>, vector<1x8x156xf32> -> vector<1x8x156xf32>
    %53 = arith.addf %47, %52 : vector<1x8x156xf32>
    %cst_25 = arith.constant 0.000000e+00 : f32
    %54 = vector.broadcast %cst_25 : f32 to vector<1x8x156xf32>
    %55 = arith.maximumf %53, %54 : vector<1x8x156xf32>
    %c0_26 = arith.constant 0 : index
    %c0_27 = arith.constant 0 : index
    %56 = vector.load %arg7[%c0_26, %c0_27] : memref<16x1xf32, #tpu.memory_space<vmem>>, vector<16x1xf32>
    %57 = vector.shape_cast %56 : vector<16x1xf32> to vector<1x16x1xf32>
    %58 = vector.shape_cast %57 : vector<1x16x1xf32> to vector<1x16x1xf32>
    %59 = vector.broadcast %58 : vector<1x16x1xf32> to vector<1x16x128xf32>
    %c0_28 = arith.constant 0 : index
    %c0_29 = arith.constant 0 : index
    %c0_30 = arith.constant 0 : index
    %60 = vector.load %arg6[%c0_28, %c0_29, %c0_30] : memref<8x16x8xf32, #tpu.memory_space<vmem>>, vector<1x16x8xf32>
    %61 = vector.shape_cast %60 : vector<1x16x8xf32> to vector<16x8xf32>
    %62 = vector.shape_cast %61 : vector<16x8xf32> to vector<1x16x8xf32>
    %63 = vector.extract_strided_slice %55 {offsets = [0, 0, 0], sizes = [1, 8, 128], strides = [1, 1, 1]} : vector<1x8x156xf32> to vector<1x8x128xf32>
    %cst_31 = arith.constant dense<0.000000e+00> : vector<1x16x128xf32>
    %64 = tpu.matmul %62, %63, %cst_31 {dimension_numbers = #tpu.dot_dimension_numbers<[2], [1], [1], [2], [0, 0, 0, 1, 1, 2], [0], [0]>} : vector<1x16x8xf32>, vector<1x8x128xf32>, vector<1x16x128xf32> -> vector<1x16x128xf32>
    %65 = arith.addf %59, %64 : vector<1x16x128xf32>
    %c1_32 = arith.constant 1 : index
    %c0_33 = arith.constant 0 : index
    %c0_34 = arith.constant 0 : index
    %66 = vector.load %arg6[%c1_32, %c0_33, %c0_34] : memref<8x16x8xf32, #tpu.memory_space<vmem>>, vector<1x16x8xf32>
    %67 = vector.shape_cast %66 : vector<1x16x8xf32> to vector<16x8xf32>
    %68 = vector.shape_cast %67 : vector<16x8xf32> to vector<1x16x8xf32>
    %69 = vector.extract_strided_slice %55 {offsets = [0, 0, 4], sizes = [1, 8, 128], strides = [1, 1, 1]} : vector<1x8x156xf32> to vector<1x8x128xf32>
    %cst_35 = arith.constant dense<0.000000e+00> : vector<1x16x128xf32>
    %70 = tpu.matmul %68, %69, %cst_35 {dimension_numbers = #tpu.dot_dimension_numbers<[2], [1], [1], [2], [0, 0, 0, 1, 1, 2], [0], [0]>} : vector<1x16x8xf32>, vector<1x8x128xf32>, vector<1x16x128xf32> -> vector<1x16x128xf32>
    %71 = arith.addf %65, %70 : vector<1x16x128xf32>
    %c2_36 = arith.constant 2 : index
    %c0_37 = arith.constant 0 : index
    %c0_38 = arith.constant 0 : index
    %72 = vector.load %arg6[%c2_36, %c0_37, %c0_38] : memref<8x16x8xf32, #tpu.memory_space<vmem>>, vector<1x16x8xf32>
    %73 = vector.shape_cast %72 : vector<1x16x8xf32> to vector<16x8xf32>
    %74 = vector.shape_cast %73 : vector<16x8xf32> to vector<1x16x8xf32>
    %75 = vector.extract_strided_slice %55 {offsets = [0, 0, 8], sizes = [1, 8, 128], strides = [1, 1, 1]} : vector<1x8x156xf32> to vector<1x8x128xf32>
    %cst_39 = arith.constant dense<0.000000e+00> : vector<1x16x128xf32>
    %76 = tpu.matmul %74, %75, %cst_39 {dimension_numbers = #tpu.dot_dimension_numbers<[2], [1], [1], [2], [0, 0, 0, 1, 1, 2], [0], [0]>} : vector<1x16x8xf32>, vector<1x8x128xf32>, vector<1x16x128xf32> -> vector<1x16x128xf32>
    %77 = arith.addf %71, %76 : vector<1x16x128xf32>
    %c3_40 = arith.constant 3 : index
    %c0_41 = arith.constant 0 : index
    %c0_42 = arith.constant 0 : index
    %78 = vector.load %arg6[%c3_40, %c0_41, %c0_42] : memref<8x16x8xf32, #tpu.memory_space<vmem>>, vector<1x16x8xf32>
    %79 = vector.shape_cast %78 : vector<1x16x8xf32> to vector<16x8xf32>
    %80 = vector.shape_cast %79 : vector<16x8xf32> to vector<1x16x8xf32>
    %81 = vector.extract_strided_slice %55 {offsets = [0, 0, 12], sizes = [1, 8, 128], strides = [1, 1, 1]} : vector<1x8x156xf32> to vector<1x8x128xf32>
    %cst_43 = arith.constant dense<0.000000e+00> : vector<1x16x128xf32>
    %82 = tpu.matmul %80, %81, %cst_43 {dimension_numbers = #tpu.dot_dimension_numbers<[2], [1], [1], [2], [0, 0, 0, 1, 1, 2], [0], [0]>} : vector<1x16x8xf32>, vector<1x8x128xf32>, vector<1x16x128xf32> -> vector<1x16x128xf32>
    %83 = arith.addf %77, %82 : vector<1x16x128xf32>
    %c4 = arith.constant 4 : index
    %c0_44 = arith.constant 0 : index
    %c0_45 = arith.constant 0 : index
    %84 = vector.load %arg6[%c4, %c0_44, %c0_45] : memref<8x16x8xf32, #tpu.memory_space<vmem>>, vector<1x16x8xf32>
    %85 = vector.shape_cast %84 : vector<1x16x8xf32> to vector<16x8xf32>
    %86 = vector.shape_cast %85 : vector<16x8xf32> to vector<1x16x8xf32>
    %87 = vector.extract_strided_slice %55 {offsets = [0, 0, 16], sizes = [1, 8, 128], strides = [1, 1, 1]} : vector<1x8x156xf32> to vector<1x8x128xf32>
    %cst_46 = arith.constant dense<0.000000e+00> : vector<1x16x128xf32>
    %88 = tpu.matmul %86, %87, %cst_46 {dimension_numbers = #tpu.dot_dimension_numbers<[2], [1], [1], [2], [0, 0, 0, 1, 1, 2], [0], [0]>} : vector<1x16x8xf32>, vector<1x8x128xf32>, vector<1x16x128xf32> -> vector<1x16x128xf32>
    %89 = arith.addf %83, %88 : vector<1x16x128xf32>
    %c5 = arith.constant 5 : index
    %c0_47 = arith.constant 0 : index
    %c0_48 = arith.constant 0 : index
    %90 = vector.load %arg6[%c5, %c0_47, %c0_48] : memref<8x16x8xf32, #tpu.memory_space<vmem>>, vector<1x16x8xf32>
    %91 = vector.shape_cast %90 : vector<1x16x8xf32> to vector<16x8xf32>
    %92 = vector.shape_cast %91 : vector<16x8xf32> to vector<1x16x8xf32>
    %93 = vector.extract_strided_slice %55 {offsets = [0, 0, 20], sizes = [1, 8, 128], strides = [1, 1, 1]} : vector<1x8x156xf32> to vector<1x8x128xf32>
    %cst_49 = arith.constant dense<0.000000e+00> : vector<1x16x128xf32>
    %94 = tpu.matmul %92, %93, %cst_49 {dimension_numbers = #tpu.dot_dimension_numbers<[2], [1], [1], [2], [0, 0, 0, 1, 1, 2], [0], [0]>} : vector<1x16x8xf32>, vector<1x8x128xf32>, vector<1x16x128xf32> -> vector<1x16x128xf32>
    %95 = arith.addf %89, %94 : vector<1x16x128xf32>
    %c6 = arith.constant 6 : index
    %c0_50 = arith.constant 0 : index
    %c0_51 = arith.constant 0 : index
    %96 = vector.load %arg6[%c6, %c0_50, %c0_51] : memref<8x16x8xf32, #tpu.memory_space<vmem>>, vector<1x16x8xf32>
    %97 = vector.shape_cast %96 : vector<1x16x8xf32> to vector<16x8xf32>
    %98 = vector.shape_cast %97 : vector<16x8xf32> to vector<1x16x8xf32>
    %99 = vector.extract_strided_slice %55 {offsets = [0, 0, 24], sizes = [1, 8, 128], strides = [1, 1, 1]} : vector<1x8x156xf32> to vector<1x8x128xf32>
    %cst_52 = arith.constant dense<0.000000e+00> : vector<1x16x128xf32>
    %100 = tpu.matmul %98, %99, %cst_52 {dimension_numbers = #tpu.dot_dimension_numbers<[2], [1], [1], [2], [0, 0, 0, 1, 1, 2], [0], [0]>} : vector<1x16x8xf32>, vector<1x8x128xf32>, vector<1x16x128xf32> -> vector<1x16x128xf32>
    %101 = arith.addf %95, %100 : vector<1x16x128xf32>
    %c7 = arith.constant 7 : index
    %c0_53 = arith.constant 0 : index
    %c0_54 = arith.constant 0 : index
    %102 = vector.load %arg6[%c7, %c0_53, %c0_54] : memref<8x16x8xf32, #tpu.memory_space<vmem>>, vector<1x16x8xf32>
    %103 = vector.shape_cast %102 : vector<1x16x8xf32> to vector<16x8xf32>
    %104 = vector.shape_cast %103 : vector<16x8xf32> to vector<1x16x8xf32>
    %105 = vector.extract_strided_slice %55 {offsets = [0, 0, 28], sizes = [1, 8, 128], strides = [1, 1, 1]} : vector<1x8x156xf32> to vector<1x8x128xf32>
    %cst_55 = arith.constant dense<0.000000e+00> : vector<1x16x128xf32>
    %106 = tpu.matmul %104, %105, %cst_55 {dimension_numbers = #tpu.dot_dimension_numbers<[2], [1], [1], [2], [0, 0, 0, 1, 1, 2], [0], [0]>} : vector<1x16x8xf32>, vector<1x8x128xf32>, vector<1x16x128xf32> -> vector<1x16x128xf32>
    %107 = arith.addf %101, %106 : vector<1x16x128xf32>
    %cst_56 = arith.constant 0.000000e+00 : f32
    %108 = vector.broadcast %cst_56 : f32 to vector<1x16x128xf32>
    %109 = arith.maximumf %107, %108 : vector<1x16x128xf32>
    %c0_57 = arith.constant 0 : index
    %c0_58 = arith.constant 0 : index
    %c0_59 = arith.constant 0 : index
    %110 = vector.load %arg8[%c0_57, %c0_58, %c0_59] : memref<1x16x128xf32, #tpu.memory_space<vmem>>, vector<1x16x128xf32>
    tpu.vector_store %arg8[%c0_57, %c0_58, %c0_59], %109 {strides = array<i32>} : memref<1x16x128xf32, #tpu.memory_space<vmem>>, vector<1x16x128xf32>,
    return
  }
  func.func @transform_0(%arg0: i32) -> (i32, i32, i32) {
    %c0_i32 = arith.constant 0 : i32
    %c0_i32_0 = arith.constant 0 : i32
    %c0_i32_1 = arith.constant 0 : i32
    return %arg0, %c0_i32, %c0_i32_0 : i32, i32, i32
  }
  func.func @transform_1(%arg0: i32) -> (i32, i32, i32) {
    %c0_i32 = arith.constant 0 : i32
    %c0_i32_0 = arith.constant 0 : i32
    %c0_i32_1 = arith.constant 0 : i32
    %c0_i32_2 = arith.constant 0 : i32
    return %c0_i32, %c0_i32_0, %c0_i32_1 : i32, i32, i32
  }
  func.func @transform_2(%arg0: i32) -> (i32, i32) {
    %c0_i32 = arith.constant 0 : i32
    %c0_i32_0 = arith.constant 0 : i32
    %c0_i32_1 = arith.constant 0 : i32
    return %c0_i32, %c0_i32_0 : i32, i32
  }
  func.func @transform_3(%arg0: i32) -> (i32, i32, i32) {
    %c0_i32 = arith.constant 0 : i32
    %c0_i32_0 = arith.constant 0 : i32
    %c0_i32_1 = arith.constant 0 : i32
    %c0_i32_2 = arith.constant 0 : i32
    return %c0_i32, %c0_i32_0, %c0_i32_1 : i32, i32, i32
  }
  func.func @transform_4(%arg0: i32) -> (i32, i32) {
    %c0_i32 = arith.constant 0 : i32
    %c0_i32_0 = arith.constant 0 : i32
    %c0_i32_1 = arith.constant 0 : i32
    return %c0_i32, %c0_i32_0 : i32, i32
  }
  func.func @transform_5(%arg0: i32) -> (i32, i32, i32) {
    %c0_i32 = arith.constant 0 : i32
    %c0_i32_0 = arith.constant 0 : i32
    %c0_i32_1 = arith.constant 0 : i32
    %c0_i32_2 = arith.constant 0 : i32
    return %c0_i32, %c0_i32_0, %c0_i32_1 : i32, i32, i32
  }
  func.func @transform_6(%arg0: i32) -> (i32, i32) {
    %c0_i32 = arith.constant 0 : i32
    %c0_i32_0 = arith.constant 0 : i32
    %c0_i32_1 = arith.constant 0 : i32
    return %c0_i32, %c0_i32_0 : i32, i32
  }
  func.func @transform_7(%arg0: i32) -> (i32, i32, i32) {
    %c0_i32 = arith.constant 0 : i32
    %c0_i32_0 = arith.constant 0 : i32
    %c0_i32_1 = arith.constant 0 : i32
    return %arg0, %c0_i32, %c0_i32_0 : i32, i32, i32
  }
}

</mosaic_0001>

<bundles_post_ra>
// kernel: tpu_custom_call.1
= control target key start
LH: loop header
LB: loop body
LE: loop exit
PB: predicated region body
PF: predicated region fallthrough
CT: control target
= control target key end

     0   :  { %12 = vsyncpa [#allocation3], 0  ;;  %s2020_s0 = inlined_call_operand.vmem [shape: f32[2,1,163], index: 0, kind: input, shape index: {}]   ;;  %s2021_s1 = inlined_call_operand.vmem [shape: f32[2,4,1], index: 1, kind: input, shape index: {}]   ;;  %s2022_s2 = inlined_call_operand.vmem [shape: f32[4,1], index: 2, kind: input, shape index: {}]   ;;  %s2023_s3 = inlined_call_operand.vmem [shape: f32[4,8,4], index: 3, kind: input, shape index: {}]   ;;  %s2024_s4 = inlined_call_operand.vmem [shape: f32[8,1], index: 4, kind: input, shape index: {}]   ;;  %s2025_s5 = inlined_call_operand.vmem [shape: f32[8,16,8], index: 5, kind: input, shape index: {}]   ;;  %s2026_s6 = inlined_call_operand.vmem [shape: f32[16,1], index: 6, kind: input, shape index: {}]   ;;  %s2027_s7 = inlined_call_operand.hbm [shape: f32[2,16,128], index: 7, kind: output, shape index: {}]  }
   0x1   :  { %14 = vsyncpa [#allocation3 + $0x1], 0  ;;  %s1806_s24 = smov 0   ;;  %s1808_s25 = smov 0  }
   0x2   :  { %s1810_s26 = smov 0   ;;  %s1812_s27 = smov 0  }
   0x3 LB: > { %s1827_s28 = sadd.s32 4294967295, %s1749_s27   ;;  %s1512_s29 = sadd.s32 4294967294, %s1749_s27   ;;  %s1749_s27 = sphi %s1812_s27, %s2033_s27   ;;  %s1745_s26 = sphi %s1810_s26, %s2032_s26   ;;  %s1741_s25 = sphi %s1808_s25, %s2031_s25   ;;  %s1737_s24 = sphi %s1806_s24, %s2030_s24  }
   0x4   : > { %s1831_s30 = sadd.s32 1, %s1749_s27   ;;  %s179_s8 = sadd.s32 1, %s1745_s26 }
   0x5   : > { %s176_s9 = ssub.s32 %s1749_s27, %s1831_s30  ;;  %p189_p0 = scmp.ne.s32.totalorder %s1745_s26, %s1741_s25 }
   0x6   : > { %p177_p1 = scmp.eq.s32.totalorder %s176_s9, 0  ;;  %p190_p2 = scmp.eq.s32.totalorder %s1827_s28, 1 }
   0x7   : > { %p195_p3 = scmp.ne.s32.totalorder %s1741_s25, %s1737_s24  ;;  %p196_p4 = scmp.eq.s32.totalorder %s1512_s29, 1 }
   0x8   : > { %s1842_s10 = scalar_select %p177_p1, %s1745_s26, %s179_s8  }
   0x9   : > { %p1844_p5 = por %p190_p2, %p189_p0  ;;  %p1848_p6 = por %p196_p4, %p195_p3 }
   0xa   : > { %p1515_p7 = scmp.ge.s32.totalorder %s1749_s27, 1  ;;  %p239_p8 = scmp.lt.s32.totalorder %s1749_s27, 3 }
   0xc   : > { %p240_p9 = pnand %p1515_p7, %p239_p8 }
   0xd   : > { %p270_p10 = scmp.lt.s32.totalorder (!%p240_p9), %s1827_s28, 1  ;;  %s1753_s29 = smov (!%p240_p9), 127  }
   0xe   : > { %243 = sbr.rel (%p240_p9) target bundleno = 946 (0x3b2), region = 48  ;;  %s1754_s13 = smov (!%p240_p9), 126  }
   0xf   : > { %s1755_s14 = smov (!%p240_p9), 124   ;;  %s1756_s15 = smov (!%p240_p9), 122  }
  0x10   : > { %s1759_s21 = smov (!%p240_p9), 112   ;;  %s1760_s22 = smov (!%p240_p9), 108  }
  0x13   : > { %v1518_v0 = vld [vmem:[%s2021_s1 + $0x4] sm:$0xf]  ;;  %v1751_v1 = vmov 0   ;;  %v275_v2 = vld [vmem:[%s2022_s2] sm:$0xf]  ;;  %s271_s19 = scalar_select %p270_p10, %s1827_s28, 1  ;;  %v288_v4 = vlaneseq }
  0x14   : > { %1687 = vset.pattern.permute.xlu0 %v1751_v1  ;;  %1688 = vset.pattern.permute.xlu1 %v1751_v1  ;;  %v281_v3 = vld [vmem:[%s2021_s1] sm:$0xf]  ;;  %v1752_v9 = vmov 0.0   ;;  %vm317_vm0 = vcmask 1039360   ;;  %vm336_vm1 = vcmask 1043456   ;;  %vm332_vm2 = vcmask 31744  }
  0x15   : > { %306 = vperm.xlu0 %1687, %v1518_v0   ;;  %278 = vperm.xlu1 %1688, %v275_v2   ;;  %s1517_s20 = sshll.u32 %s271_s19, 1  ;;  %v289_v5 = vshrl.u32 %v288_v4, 7  ;;  %v331_v28 = vld [vmem:[%s2023_s3] sm:$0xff]  ;;  %vm422_vm3 = vcmask 1031168   ;;  %v1522_v32 = vld [vmem:[%s2023_s3 + $0x8] sm:$0xff]  ;;  %vm510_vm4 = vcmask 1014784  }
  0x16   : > { %s273_s23 = scalar_lea.vmem %s2020_s0, %s1517_s20  ;;  %407 = vmatprep.mubr.f32.mxu0 %v1752_v9  ;;  %495 = vmatprep.mubr.f32.mxu1 %v1752_v9  ;;  %v325_v29 = vld [vmem:[%s2024_s4] sm:$0xff]  ;;  %v1526_v36 = vld [vmem:[%s2023_s3 + $0x10] sm:$0xff]  ;;  %vm598_vm5 = vcmask 998400   ;;  %v1530_v40 = vld [vmem:[%s2023_s3 + $0x18] sm:$0xff]  ;;  %vm696_vm6 = vcmask 64512   ;;  %s1757_s19 = smov 120  }
  0x17   : > { %v290_v6 = vsub.s32 0, %v289_v5  ;;  %v294_v7 = vsub.s32 1, %v289_v5  ;;  %v274_v8 = vld [vmem:[%s273_s23] sm:$0x3]  ;;  %v1536_v48 = vld [vmem:[%s2025_s5 + $0x10] sm:$0xff]  ;;  %v695_v62 = vld [vmem:[%s2025_s5 + $0x8] sm:$0xff] }
  0x18   : > { %v694_v42 = vld [vmem:[%s2025_s5] sm:$0xff]  ;;  %s1758_s20 = smov 116   ;;  %s1761_s23 = smov 104   ;;  %v683_v2 = vld [vmem:[%s2026_s6 + $0x8] sm:$0xff]  ;;  %vm881_vm7 = vcmask 982016   ;;  %vm974_vm8 = vcmask 949248  }
  0x19   : > { %284 = vperm.xlu0 %1687, %v281_v3   ;;  %v291_v10 = vrot.slane %v274_v8, %v290_v6  ;;  %v295_v11 = vrot.slane %v274_v8, %v294_v7  ;;  %v1540_v0 = vld [vmem:[%s2025_s5 + $0x20] sm:$0xff]  ;;  %v1537_v6 = vld [vmem:[%s2025_s5 + $0x18] sm:$0xff]  ;;  %v1544_v8 = vld [vmem:[%s2025_s5 + $0x30] sm:$0xff]  ;;  %vm1067_vm9 = vcmask 916480   ;;  %vm1160_vm10 = vcmask 883712  }
  0x1a   : > { %v682_v1 = vld [vmem:[%s2026_s6] sm:$0xff]  ;;  %vm1253_vm11 = vcmask 850944   ;;  %vm1346_vm12 = vcmask 818176  }
  0x90   : > { %v307_v12 = vpop.permute.xlu0 %306  ;;  %v279_v18 = vpop.permute.xlu1 %278 }
  0x91   : > { %v309_v13 = vmul.f32 %v307_v12, %v291_v10  ;;  %v310_v14 = vmul.f32 %v307_v12, %v295_v11 }
  0x93   : > { %315 = vrot.lane.b32.xlu0 %v310_v14, %s1753_s29  ;;  %313 = vrot.lane.b32.xlu1 %v309_v13, %s1753_s29  ;;  %s1762_s29 = smov 100   ;;  %v1548_v13 = vld [vmem:[%s2025_s5 + $0x40] sm:$0xff] }
  0x94   : > { %v285_v15 = vpop.permute.xlu0 %284 }
  0x95   : > { %v299_v16 = vmul.f32 %v295_v11, %v285_v15  ;;  %v298_v17 = vmul.f32 %v291_v10, %v285_v15  ;;  %v1541_v11 = vld [vmem:[%s2025_s5 + $0x28] sm:$0xff] }
  0x97   : > { %v301_v19 = vadd.f32 %v299_v16, %v279_v18  ;;  %v300_v20 = vadd.f32 %v298_v17, %v279_v18  ;;  %v1545_v16 = vld [vmem:[%s2025_s5 + $0x38] sm:$0xff]  ;;  %v1552_v18 = vld [vmem:[%s2025_s5 + $0x50] sm:$0xff] }
 0x105   : > { %v316_v21 = vpop.permute.xlu0 %315  ;;  %v314_v22 = vpop.permute.xlu1 %313 }
 0x106   : > { %v322_v23 = vadd.f32 %v316_v21, %v301_v19  ;;  %v318_v24 = vsel %vm317_vm0, %v314_v22, %v316_v21  ;;  %v1549_v21 = vld [vmem:[%s2025_s5 + $0x48] sm:$0xff] }
 0x107   : > { %v321_v25 = vadd.f32 %v318_v24, %v300_v20 }
 0x108   : > { %v324_v26 = vmax.f32 %v322_v23, 0.0  ;;  %v1556_v23 = vld [vmem:[%s2025_s5 + $0x60] sm:$0xff] }
 0x109   : > { %v323_v27 = vmax.f32 %v321_v25, 0.0 }
 0x10a   : > { %420 = vrot.lane.b32.xlu0 %v324_v26, %s1754_s13  ;;  %1519 = vmatprep.subr.msk.mxu0 %vm336_vm1, %v324_v26 }
 0x10b   : > { %418 = vrot.lane.b32.xlu1 %v323_v27, %s1754_s13  ;;  %1520 = vmatpush1.msk.msra.mxu0 %vm336_vm1, %v323_v27 }
 0x10c   : > { %1521 = vmatmul.mubr.msk.f32.vlgmr.msra.gmra.mxu0 %vm332_vm2, %v331_v28  ;;  %v1560_v28 = vld [vmem:[%s2025_s5 + $0x70] sm:$0xff] }
 0x10d   : > { %583 = vmatprep.mubr.f32.mxu0 %v1752_v9 }
 0x10e   : > { %508 = vrot.lane.b32.xlu0 %v324_v26, %s1755_s14 }
 0x10f   : > { %506 = vrot.lane.b32.xlu1 %v323_v27, %s1755_s14 }
 0x112   : > { %596 = vrot.lane.b32.xlu0 %v324_v26, %s1756_s15  ;;  %v1553_v26 = vld [vmem:[%s2025_s5 + $0x58] sm:$0xff] }
 0x113   : > { %594 = vrot.lane.b32.xlu1 %v323_v27, %s1756_s15  ;;  %s1569_s15 = sshll.u32 %s1827_s28, 8  ;;  %s1763_s28 = smov [#allocation2]  }
 0x114   : > { %s1978_s18 = scalar_lea.hbm %s2027_s7, %s1569_s15 }
 0x117   : > { %328 = vperm.xlu1 %1688, %v325_v29  }
 0x17c   : > { %v421_v30 = vpop.permute.xlu0 %420 }
 0x17d   : > { %1523 = vmatprep.subr.msk.mxu1 %vm336_vm1, %v421_v30  ;;  %v419_v31 = vpop.permute.xlu1 %418 }
 0x17e   : > { %v423_v33 = vsel %vm422_vm3, %v419_v31, %v421_v30  ;;  %v1557_v31 = vld [vmem:[%s2025_s5 + $0x68] sm:$0xff] }
 0x17f   : > { %1524 = vmatpush1.msk.msra.mxu1 %vm336_vm1, %v423_v33 }
 0x180   : > { %v509_v34 = vpop.permute.xlu0 %508  ;;  %1525 = vmatmul.mubr.msk.f32.vlgmr.msra.gmra.mxu1 %vm332_vm2, %v1522_v32 }
 0x181   : > { %v507_v35 = vpop.permute.xlu1 %506  ;;  %1527 = vmatprep.subr.msk.mxu0 %vm336_vm1, %v509_v34  ;;  %671 = vmatprep.mubr.f32.mxu1 %v1752_v9 }
 0x182   : > { %v511_v37 = vsel %vm510_vm4, %v507_v35, %v509_v34  ;;  %v1561_v35 = vld [vmem:[%s2025_s5 + $0x78] sm:$0xff] }
 0x183   : > { %1528 = vmatpush1.msk.msra.mxu0 %vm336_vm1, %v511_v37 }
 0x184   : > { %v597_v38 = vpop.permute.xlu0 %596  ;;  %1529 = vmatmul.mubr.msk.f32.vlgmr.msra.gmra.mxu0 %vm332_vm2, %v1526_v36 }
 0x185   : > { %1531 = vmatprep.subr.msk.mxu1 %vm336_vm1, %v597_v38  ;;  %v595_v39 = vpop.permute.xlu1 %594  ;;  %1596 = vmatprep.mubr.msk.f32.mxu0 %vm696_vm6, %v694_v42 }
 0x186   : > { %v599_v41 = vsel %vm598_vm5, %v595_v39, %v597_v38 }
 0x187   : > { %1532 = vmatpush1.msk.msra.mxu1 %vm336_vm1, %v599_v41 }
 0x188   : > { %1533 = vmatmul.mubr.msk.f32.vlgmr.msra.gmra.mxu1 %vm332_vm2, %v1530_v40 }
 0x189   : > { %1601 = vmatprep.mubr.msk.f32.mxu1 %vm696_vm6, %v1536_v48 }
 0x192   : > { %v329_v45 = vpop.permute.xlu1 %328 }
 0x1cc   : > { %v409_v43 = vpop.f32.mrf.mxu0 }
 0x1cd   : > { %v414_v47 = vadd.f32 %v409_v43, %v329_v45 }
 0x1ce   : > { %v411_v46 = vpop.f32.mrf.mxu0 }
 0x1cf   : > { %v415_v51 = vadd.f32 %v411_v46, %v329_v45 }
 0x240   : > { %v497_v44 = vpop.f32.mrf.mxu1 }
 0x241   : > { %v502_v52 = vadd.f32 %v497_v44, %v414_v47 }
 0x242   : > { %v499_v49 = vpop.f32.mrf.mxu1 }
 0x243   : > { %v503_v54 = vadd.f32 %v499_v49, %v415_v51 }
 0x244   : > { %v585_v50 = vpop.f32.mrf.mxu0 }
 0x245   : > { %v590_v55 = vadd.f32 %v585_v50, %v502_v52 }
 0x246   : > { %v587_v53 = vpop.f32.mrf.mxu0 }
 0x247   : > { %v591_v57 = vadd.f32 %v587_v53, %v503_v54 }
 0x248   : > { %v673_v56 = vpop.f32.mrf.mxu1 }
 0x249   : > { %v678_v58 = vadd.f32 %v673_v56, %v590_v55 }
 0x24a   : > { %v675_v59 = vpop.f32.mrf.mxu1 }
 0x24b   : > { %v680_v60 = vmax.f32 %v678_v58, 0.0  ;;  %v679_v61 = vadd.f32 %v675_v59, %v591_v57 }
 0x24d   : > { %v681_v63 = vmax.f32 %v679_v61, 0.0  ;;  %785 = vrot.lane.b32.xlu0 %v680_v60, %s1755_s14  ;;  %1594 = vmatprep.subr.mxu0 %v680_v60 }
 0x24e   : > { %1595 = vmatpush3.msra.mxu0 %v680_v60 }
 0x24f   : > { %1597 = vmatmul.mubr.msk.f32.vlgmr.msra.gmra.mxu0 %vm696_vm6, %v695_v62  ;;  %787 = vrot.lane.b32.xlu1 %v681_v63, %s1755_s14  ;;  %s267_s14 = sand.u32 1, %s1741_s25  }
 0x250   : > { %1606 = vmatprep.mubr.msk.f32.mxu0 %vm696_vm6, %v1540_v0  ;;  %s1516_s8 = sshll.u32 %s267_s14, 4 }
 0x251   : > { %877 = vrot.lane.b32.xlu0 %v680_v60, %s1757_s19  ;;  %s269_s9 = scalar_lea.vmem [#allocation2], %s1516_s8 }
 0x252   : > { %s1450_s13 = sshll.u32 %s269_s9, 4  ;;  %s1973_s13 = int_to_ptr.vmem [resolvable:$true] %s1450_s13 }
 0x253   : > { %879 = vrot.lane.b32.xlu1 %v681_v63, %s1757_s19  ;;  %s1980_s19 = scalar_lea.sflag [#allocation3], %s267_s14 }
 0x255   : > { %970 = vrot.lane.b32.xlu0 %v680_v60, %s1758_s20 }
 0x257   : > { %972 = vrot.lane.b32.xlu1 %v681_v63, %s1758_s20  ;;  %s1689_s20 = scalar_lea.vmem %s1973_s13, 256 }
 0x258   : > { %p1690_p11 = scmp.ne.s32.totalorder %s1973_s13, %s1689_s20 }
 0x259   : > { %1063 = vrot.lane.b32.xlu0 %v680_v60, %s1759_s21 }
 0x25a   : > { %p1691_p12 = pnand %p1690_p11, %p1844_p5 }
 0x25b   : > { %1065 = vrot.lane.b32.xlu1 %v681_v63, %s1759_s21  ;;  %s1693_s21 = sshll.u32 %s1763_s28, 4  ;;  %s1694_s21 = int_to_ptr.vmem [resolvable:$false] %s1693_s21 }
 0x25c   : > { %p1692_p13 = pneg %p1691_p12  ;;  %p1696_p0 = scmp.lt.s32.totalorder %s1973_s13, %s1694_s21 }
 0x25d   : > { %1156 = vrot.lane.b32.xlu0 %v680_v60, %s1760_s22 }
 0x25f   : > { %1158 = vrot.lane.b32.xlu1 %v681_v63, %s1760_s22  ;;  %s1695_s22 = scalar_lea.vmem %s1694_s21, 512 }
 0x260   : > { %p1697_p1 = scmp.lt.s32.totalorder %s1695_s22, %s1689_s20 }
 0x261   : > { %1249 = vrot.lane.b32.xlu0 %v680_v60, %s1761_s23 }
 0x262   : > { %p1698_p2 = por %p1697_p1, %p1696_p0 }
 0x263   : > { %1251 = vrot.lane.b32.xlu1 %v681_v63, %s1761_s23 }
 0x264   : > { %p1699_p3 = pnand %p1698_p2, %p1692_p13 }
 0x265   : > { %1342 = vrot.lane.b32.xlu0 %v680_v60, %s1762_s29 }
 0x267   : > { %1344 = vrot.lane.b32.xlu1 %v681_v63, %s1762_s29 }
 0x269   : > { %686 = vperm.xlu0 %1687, %v682_v1  }
 0x26b   : > { %691 = vperm.xlu1 %1688, %v683_v2  }
 0x2bf   : > { %v786_v3 = vpop.permute.xlu0 %785 }
 0x2c1   : > { %v788_v4 = vpop.permute.xlu1 %787 }
 0x2c2   : > { %v789_v5 = vsel %vm510_vm4, %v786_v3, %v788_v4 }
 0x2c3   : > { %v878_v7 = vpop.permute.xlu0 %877  ;;  %1599 = vmatprep.subr.mxu1 %v789_v5 }
 0x2c4   : > { %1600 = vmatpush3.msra.mxu1 %v789_v5 }
 0x2c5   : > { %1602 = vmatmul.mubr.msk.f32.vlgmr.msra.gmra.mxu1 %vm696_vm6, %v1537_v6  ;;  %v880_v9 = vpop.permute.xlu1 %879 }
 0x2c6   : > { %v882_v10 = vsel %vm881_vm7, %v878_v7, %v880_v9  ;;  %1611 = vmatprep.mubr.msk.f32.mxu1 %vm696_vm6, %v1544_v8 }
 0x2c7   : > { %v971_v12 = vpop.permute.xlu0 %970  ;;  %1604 = vmatprep.subr.mxu0 %v882_v10 }
 0x2c8   : > { %1605 = vmatpush3.msra.mxu0 %v882_v10 }
 0x2c9   : > { %1607 = vmatmul.mubr.msk.f32.vlgmr.msra.gmra.mxu0 %vm696_vm6, %v1541_v11  ;;  %v973_v14 = vpop.permute.xlu1 %972 }
 0x2ca   : > { %v975_v15 = vsel %vm974_vm8, %v971_v12, %v973_v14  ;;  %1616 = vmatprep.mubr.msk.f32.mxu0 %vm696_vm6, %v1548_v13 }
 0x2cb   : > { %v1064_v17 = vpop.permute.xlu0 %1063  ;;  %1609 = vmatprep.subr.mxu1 %v975_v15 }
 0x2cc   : > { %1610 = vmatpush3.msra.mxu1 %v975_v15 }
 0x2cd   : > { %1612 = vmatmul.mubr.msk.f32.vlgmr.msra.gmra.mxu1 %vm696_vm6, %v1545_v16  ;;  %v1066_v19 = vpop.permute.xlu1 %1065 }
 0x2ce   : > { %v1068_v20 = vsel %vm1067_vm9, %v1064_v17, %v1066_v19  ;;  %1621 = vmatprep.mubr.msk.f32.mxu1 %vm696_vm6, %v1552_v18 }
 0x2cf   : > { %v1157_v22 = vpop.permute.xlu0 %1156  ;;  %1614 = vmatprep.subr.mxu0 %v1068_v20 }
 0x2d0   : > { %1615 = vmatpush3.msra.mxu0 %v1068_v20 }
 0x2d1   : > { %1617 = vmatmul.mubr.msk.f32.vlgmr.msra.gmra.mxu0 %vm696_vm6, %v1549_v21  ;;  %v1159_v24 = vpop.permute.xlu1 %1158 }
 0x2d2   : > { %v1161_v25 = vsel %vm1160_vm10, %v1157_v22, %v1159_v24  ;;  %1626 = vmatprep.mubr.msk.f32.mxu0 %vm696_vm6, %v1556_v23 }
 0x2d3   : > { %v1250_v27 = vpop.permute.xlu0 %1249  ;;  %1619 = vmatprep.subr.mxu1 %v1161_v25 }
 0x2d4   : > { %1620 = vmatpush3.msra.mxu1 %v1161_v25 }
 0x2d5   : > { %1622 = vmatmul.mubr.msk.f32.vlgmr.msra.gmra.mxu1 %vm696_vm6, %v1553_v26  ;;  %v1252_v29 = vpop.permute.xlu1 %1251 }
 0x2d6   : > { %v1254_v30 = vsel %vm1253_vm11, %v1250_v27, %v1252_v29  ;;  %1631 = vmatprep.mubr.msk.f32.mxu1 %vm696_vm6, %v1560_v28 }
 0x2d7   : > { %1624 = vmatprep.subr.mxu0 %v1254_v30  ;;  %v1343_v32 = vpop.permute.xlu0 %1342 }
 0x2d8   : > { %1625 = vmatpush3.msra.mxu0 %v1254_v30 }
 0x2d9   : > { %1627 = vmatmul.mubr.msk.f32.vlgmr.msra.gmra.mxu0 %vm696_vm6, %v1557_v31  ;;  %v1345_v33 = vpop.permute.xlu1 %1344 }
 0x2da   : > { %v1347_v34 = vsel %vm1346_vm12, %v1343_v32, %v1345_v33 }
 0x2db   : > { %1629 = vmatprep.subr.mxu1 %v1347_v34 }
 0x2dc   : > { %1630 = vmatpush3.msra.mxu1 %v1347_v34 }
 0x2dd   : > { %1632 = vmatmul.mubr.msk.f32.vlgmr.msra.gmra.mxu1 %vm696_vm6, %v1561_v35 }
 0x2e4   : > { %v687_v44 = vpop.permute.xlu0 %686 }
 0x2e6   : > { %v692_v41 = vpop.permute.xlu1 %691 }
 0x30f   : > { %v1598_v36 = vpop.f32.mrf.mxu0 }
 0x310   : > { %v779_v43 = vadd.f32 %v1598_v36, %v692_v41 }
 0x311   : > { %v769_v38 = vpop.f32.mrf.mxu0 }
 0x312   : > { %v778_v46 = vadd.f32 %v769_v38, %v687_v44 }
 0x385   : > { %v1603_v37 = vpop.f32.mrf.mxu1 }
 0x386   : > { %v873_v47 = vadd.f32 %v1603_v37, %v779_v43 }
 0x387   : > { %v863_v39 = vpop.f32.mrf.mxu1 }
 0x388   : > { %v872_v50 = vadd.f32 %v863_v39, %v778_v46 }
 0x389   : > { %v1608_v40 = vpop.f32.mrf.mxu0 }
 0x38a   : > { %v966_v51 = vadd.f32 %v1608_v40, %v873_v47 }
 0x38b   : > { %v956_v45 = vpop.f32.mrf.mxu0 }
 0x38c   : > { %v965_v53 = vadd.f32 %v956_v45, %v872_v50 }
 0x38d   : > { %v1613_v42 = vpop.f32.mrf.mxu1 }
 0x38e   : > { %v1059_v54 = vadd.f32 %v1613_v42, %v966_v51 }
 0x38f   : > { %v1049_v48 = vpop.f32.mrf.mxu1 }
 0x390   : > { %v1058_v56 = vadd.f32 %v1049_v48, %v965_v53 }
 0x391   : > { %v1618_v49 = vpop.f32.mrf.mxu0 }
 0x392   : > { %v1152_v57 = vadd.f32 %v1618_v49, %v1059_v54 }
 0x393   : > { %v1142_v55 = vpop.f32.mrf.mxu0 }
 0x394   : > { %v1151_v60 = vadd.f32 %v1142_v55, %v1058_v56 }
 0x395   : > { %v1623_v52 = vpop.f32.mrf.mxu1 }
 0x396   : > { %v1245_v61 = vadd.f32 %v1623_v52, %v1152_v57 }
 0x397   : > { %v1235_v58 = vpop.f32.mrf.mxu1 }
 0x398   : > { %v1244_v63 = vadd.f32 %v1235_v58, %v1151_v60 }
 0x399   : > { %v1628_v59 = vpop.f32.mrf.mxu0 }
 0x39a   : > { %v1338_v0 = vadd.f32 %v1628_v59, %v1245_v61 }
 0x39b   : > { %v1328_v62 = vpop.f32.mrf.mxu0 }
 0x39c   : > { %v1337_v2 = vadd.f32 %v1328_v62, %v1244_v63 }
 0x39d   : > { %v1633_v1 = vpop.f32.mrf.mxu1 }
 0x39e   : > { %v1431_v3 = vadd.f32 %v1633_v1, %v1338_v0 }
 0x39f   : > { %v1421_v4 = vpop.f32.mrf.mxu1 }
 0x3a0   : > { %v1433_v5 = vmax.f32 %v1431_v3, 0.0  ;;  %v1430_v6 = vadd.f32 %v1421_v4, %v1337_v2 }
 0x3a2   : > { %1435 = vst [vmem:[%s269_s9 + $0x8] sm:$0xff] %v1433_v5  ;;  %v1432_v7 = vmax.f32 %v1430_v6, 0.0 }
 0x3a4   : > { %1434 = vst [vmem:[%s269_s9] sm:$0xff] %v1432_v7 }
 0x3a5   : > { %1702 = shalt.err (!%p1699_p3)
}
 0x3a6   : > { %s1703_s23 = scalar_lea.hbm %s1978_s18, 256  ;;  %s1707_s8 = scalar_lea.hbm %s2027_s7, 512 }
 0x3a7   : > { %p1704_p4 = scmp.ne.s32.totalorder %s1978_s18, %s1703_s23  ;;  %p1708_p9 = scmp.lt.s32.totalorder %s1978_s18, %s2027_s7 }
 0x3a8   : > { %p1709_p10 = scmp.lt.s32.totalorder %s1707_s8, %s1703_s23 }
 0x3a9   : > { %p1705_p7 = pnand %p1704_p4, %p1844_p5 }
 0x3aa   : > { %p1710_p11 = por %p1709_p10, %p1708_p9 }
 0x3ab   : > { %p1706_p8 = pneg %p1705_p7 }
 0x3ad   : > { %p1711_p12 = pnand %p1710_p11, %p1706_p8 }
 0x3af   : > { %1714 = shalt.err (!%p1711_p12)
}
 0x3b0   : > { %s1764_s16 = smov 128   ;;  %s1765_s17 = smov 8  }
 0x3b1   : > { %1634 = dma.vmem_to_hbm [thread:$0]  (%p1844_p5), %s1973_s13, 256, %s1978_s18, %s1980_s19, %s1764_s16, %s1764_s16, %s1765_s17  }
 0x3b2 PF: > { %p1640_p13 = scmp.ge.s32.totalorder %s1749_s27, 2  ;;  %s1465_s20 = sand.u32 1, %s1737_s24  }
 0x3b3   : > { %s1466_s28 = scalar_lea.sflag [#allocation3], %s1465_s20 }
 0x3b4   : > { %p1637_p0 = pnand %p1640_p13, %p1848_p6 }
 0x3b6   : > { %p1638_p1 = pneg %p1637_p0 }
 0x3b8   : > { %1732 = dma.done.wait (%p1638_p1), %s1466_s28, 256  }
 0x3b9   : > { %1734 = vsyncadd (%p1638_p1), %s1466_s28, 4294967040  ;;  %p17_p2 = scmp.ge.s32.totalorder %s1831_s30, 4   ;;  %s2030_s24 = smov %s1741_s25 }
 0x3ba   : > { %s2031_s25 = smov %s1745_s26  ;;  %s2032_s26 = smov %s1842_s10 }
 0x3bb   : > { %s2033_s27 = smov %s1831_s30  ;;  %19 = sbr.rel (!%p17_p2) target bundleno = 3 (0x3), region = 94 }
 0x3c0   :  { %1471 = vsyncpa [#allocation3], 1 }
 0x3c1   :  { %1473 = vsyncpa [#allocation3 + $0x1], 1 }

</bundles_post_ra>
